<compile_context>
chip_gen: v7x
topology: tpu7x:2x2x1
jax: 0.10.0
libtpu: 0.0.40
codegen_flags: <defaults>
</compile_context>

<pallas_src>
import functools

import jax
import jax.numpy as jnp
from jax import lax
from jax.experimental import pallas as pl
from jax.experimental.pallas import tpu as pltpu

CONV_K = 4               # nn.Conv2d(1, 1, 4)
POOL = 8                 # nn.MaxPool2d(kernel_size=8)  (stride = kernel, floor mode)
H_IN = W_IN = 256        # input spatial -> conv 253x253 -> pool 31x31 -> 961 features
P_OUT = 31               # pooled spatial size


@functools.lru_cache(maxsize=None)
def _roll_conventions():
    """Probe pltpu.roll's rotation convention on BOTH axes (sublane, lane).

    Returns (sub_lower, lane_lower) where True means out[i] == in[i - shift]
    (numpy convention).  Host-side constant prep adapts to either convention.
    """
    def probe(x_ref, lane_ref, sub_ref):
        lane_ref[...] = pltpu.roll(x_ref[...], 1, 1)
        sub_ref[...] = pltpu.roll(x_ref[...], 1, 0)

    x = (1000.0 * jnp.arange(8, dtype=jnp.float32)[:, None]
         + jnp.arange(128, dtype=jnp.float32)[None, :])
    lane, sub = pl.pallas_call(
        probe,
        out_shape=(jax.ShapeDtypeStruct((8, 128), jnp.float32),
                   jax.ShapeDtypeStruct((8, 128), jnp.float32)))(x)
    lane_lower = bool(lane[0, 0] == 127.0)     # out[0] = in[-1]  -> pulls from lower idx
    sub_lower = bool(sub[0, 0] == 7000.0)
    return sub_lower, lane_lower


@functools.lru_cache(maxsize=None)
def _chip_config():
    """(use_mxu, bt_pref, vmem_limit_bytes, two_tensorcores) per TPU generation."""
    kind = jax.devices()[0].device_kind.lower()
    if any(t in kind for t in ("v2", "v3", "v4", "v5")):
        # v5e and older: slow MXU / no bf16 VPU -> keep proven f32 VPU conv;
        # 128 MiB VMEM -> big blocks (BT=16) are fine, budget includes the 3 cached
        # lane-rolled slabs (3 * 4 MiB) + double-buffered input + head constants.
        return False, 16, 96 * 1024 * 1024, False
    if "v6" in kind:
        # v6e: MXU conv in bf16, 128 MiB VMEM -> BT=16.
        return True, 16, 96 * 1024 * 1024, False
    # v7x (or unknown/future): MXU conv in bf16, but only 64 MiB VMEM per TensorCore
    # -> keep BT=8 and vmem_limit <= 40 MiB; batch axis parallel across the 2 TCs.
    return True, 8, 40 * 1024 * 1024, True


def _pool_and_head(acc, wmap_ref, lb_ref, o_ref):
    """Shared MaxPool2d(8) + Linear(961,1) tail operating on the f32 conv slab."""
    # MaxPool2d(8): roll-max doubling tree (shifts 1/2/4) along lanes then sublanes
    # (all XLU work).  The max of pool window (p,q) of image b lands at a fixed
    # stride-8 readout position inside the slab.
    m = acc
    for s in (1, 2, 4):
        m = jnp.maximum(m, pltpu.roll(m, s, 1))
    for s in (1, 2, 4):
        m = jnp.maximum(m, pltpu.roll(m, s, 0))

    # Linear(961,1): wmap_ref is a host-tiled (BT*256,256) map holding the linear
    # weights at the readout positions and 0 elsewhere, so the head is one 2-D
    # elementwise multiply (no 3-D broadcast temp) + per-image reduction, all f32.
    bt = o_ref.shape[0]
    z = m * wmap_ref[...]                                    # (BT*256, 256) f32
    r = jnp.sum(z.reshape(bt, H_IN, W_IN), axis=2)           # (BT, 256)  lane reduce
    o_ref[...] = jnp.sum(r, axis=1, keepdims=True) + lb_ref[0]


def _ndvi_kernel_mxu(x_ref, cmat_ref, wmap_ref, lb_ref, o_ref):
    # x_ref   : (BT*256, 256) bf16 VMEM -- BT images stacked along sublanes
    # cmat_ref: (4, 256, 256) bf16 VMEM -- banded lane-conv matrices (one per conv row)
    # wmap_ref: (BT*256, 256) f32 VMEM  -- tiled linear-weight readout map
    # lb_ref  : (1,) f32 SMEM           -- linear bias with conv bias folded in
    # o_ref   : (BT, 1) f32 VMEM
    x = x_ref[...]                                           # bf16
    # Conv2d(1,1,4): 4 MXU matmuls (bf16 in, f32 accumulate) do the lane-direction
    # taps; the sublane-direction shift is applied to the f32 *outputs* with 3 cheap
    # aligned rolls (never roll packed bf16 data).
    acc = jnp.dot(x, cmat_ref[0], preferred_element_type=jnp.float32)
    for ki in range(1, CONV_K):
        y = jnp.dot(x, cmat_ref[ki], preferred_element_type=jnp.float32)
        acc = acc + pltpu.roll(y, ki, 0)
    # Valid conv outputs sit at fixed per-image offsets; roll wrap-around rows/cols
    # are never selected by the pool readout positions below.
    _pool_and_head(acc, wmap_ref, lb_ref, o_ref)


def _ndvi_kernel_vpu(x_ref, cw_ref, wmap_ref, lb_ref, o_ref):
    # f32 VPU conv path (v5e and older): 3 lane rolls + 3 sublane rolls + 16 FMAs.
    # The 3 cached lane-rolled slabs are budgeted in the 96 MiB vmem_limit.
    x = x_ref[...]                                           # (BT*256, 256) f32
    xl = [x] + [pltpu.roll(x, kj, 1) for kj in range(1, CONV_K)]
    acc = None
    for ki in range(CONV_K):
        row = cw_ref[ki * CONV_K] * xl[0]
        for kj in range(1, CONV_K):
            row = row + cw_ref[ki * CONV_K + kj] * xl[kj]
        if ki:
            row = pltpu.roll(row, ki, 0)
        acc = row if acc is None else acc + row
    _pool_and_head(acc, wmap_ref, lb_ref, o_ref)


def ndvi_forward(x_nchw, conv_w, conv_b, lin_w, lin_b):
    use_mxu, bt_pref, vmem_bytes, two_tc = _chip_config()
    sub_lower, lane_lower = _roll_conventions()
    B = x_nchw.shape[0]
    # Keep BT a multiple of 8 (aligned output blocks); shrink BT for small batches
    # (avoids excess zero-padding compute, and on v7x keeps >=2 grid steps when the
    # batch allows it so both TensorCores get work).
    bt = bt_pref
    while bt > 8 and (bt >= 2 * B or (two_tc and pl.cdiv(B, bt) < 2)):
        bt //= 2
    return _ndvi_forward(x_nchw, conv_w, conv_b, lin_w, lin_b,
                         use_mxu=use_mxu, bt=bt, vmem_bytes=vmem_bytes,
                         sub_lower=sub_lower, lane_lower=lane_lower)


@functools.partial(jax.jit, static_argnames=("use_mxu", "bt", "vmem_bytes",
                                             "sub_lower", "lane_lower"))
def _ndvi_forward(x_nchw, conv_w, conv_b, lin_w, lin_b, *,
                  use_mxu, bt, vmem_bytes, sub_lower, lane_lower):
    B = x_nchw.shape[0]
    nb = pl.cdiv(B, bt)
    b_pad = nb * bt

    x = x_nchw.reshape(B, H_IN, W_IN).astype(jnp.float32)    # squeeze C == 1
    if b_pad != B:                                           # pad batch; sliced off below
        x = jnp.concatenate(
            [x, jnp.zeros((b_pad - B, H_IN, W_IN), jnp.float32)], axis=0)
    x2 = x.reshape(b_pad * H_IN, W_IN)                       # stack images along sublanes

    w = conv_w.reshape(CONV_K, CONV_K).astype(jnp.float32)

    # Pool-window readout offsets inside the slab (depend on roll convention; the
    # MXU path handles the lane-direction taps inside the banded matrix, so its
    # column offset only carries the pool-tree shift).
    row_off = (CONV_K - 1) + (POOL - 1) if sub_lower else 0
    if use_mxu:
        col_off = (POOL - 1) if lane_lower else 0
    else:
        col_off = (CONV_K - 1) + (POOL - 1) if lane_lower else 0

    # Linear(961,1) weights scattered at the readout positions, tiled per image so
    # the in-kernel head stays 2-D.
    rpos = POOL * jnp.arange(P_OUT) + row_off
    cpos = POOL * jnp.arange(P_OUT) + col_off
    wmap = jnp.zeros((H_IN, W_IN), jnp.float32).at[
        rpos[:, None], cpos[None, :]].set(lin_w.reshape(P_OUT, P_OUT).astype(jnp.float32))
    wmap_rep = jnp.tile(wmap, (bt, 1))                       # (BT*256, 256)

    # Fold the conv bias into the linear bias (constant commutes with max-pool & sum):
    # out = sum lw*(pool + cb) + lb = sum lw*pool + (lb + cb*sum(lw)).
    lb = (lin_b.reshape(-1).astype(jnp.float32)
          + conv_b.reshape(-1).astype(jnp.float32) * jnp.sum(lin_w.astype(jnp.float32)))

    if use_mxu:
        # Banded lane-conv matrices: cmat[ki][j+d, j] = w_row[ki][d], d in [0,4).
        rows = w[::-1, :] if sub_lower else w                # sublane tap order
        eyes = jnp.stack([jnp.eye(H_IN, k=-d, dtype=jnp.float32) for d in range(CONV_K)])
        cmat = jnp.einsum("kd,dij->kij", rows, eyes).astype(jnp.bfloat16)
        x_in = x2.astype(jnp.bfloat16)                       # halve HBM traffic
        kernel = _ndvi_kernel_mxu
        conv_args = (x_in, cmat)
        conv_specs = [
            pl.BlockSpec((bt * H_IN, W_IN), lambda i: (i, 0)),        # image slab (bf16)
            pl.BlockSpec((CONV_K, H_IN, W_IN), lambda i: (0, 0, 0)),  # banded conv mats
        ]
        flops = b_pad * (2 * CONV_K * H_IN * H_IN * W_IN + 10 * H_IN * W_IN)
        bytes_acc = x_in.size * 2 + cmat.size * 2 + wmap_rep.size * 4 + b_pad * 4
    else:
        cw = w[::-1, :] if sub_lower else w
        cw = cw[:, ::-1] if lane_lower else cw
        kernel = _ndvi_kernel_vpu
        conv_args = (x2, cw.reshape(-1))
        conv_specs = [
            pl.BlockSpec((bt * H_IN, W_IN), lambda i: (i, 0)),        # image slab (f32)
            pl.BlockSpec(memory_space=pltpu.MemorySpace.SMEM),        # conv taps
        ]
        flops = b_pad * (2 * CONV_K * CONV_K * H_IN * W_IN + 8 * H_IN * W_IN)
        bytes_acc = x2.size * 4 + wmap_rep.size * 4 + b_pad * 4

    out = pl.pallas_call(
        kernel,
        out_shape=jax.ShapeDtypeStruct((b_pad, 1), jnp.float32),
        grid=(nb,),
        in_specs=conv_specs + [
            pl.BlockSpec((bt * H_IN, W_IN), lambda i: (0, 0)),        # tiled weight map
            pl.BlockSpec(memory_space=pltpu.MemorySpace.SMEM),        # folded bias
        ],
        out_specs=pl.BlockSpec((bt, 1), lambda i: (i, 0)),
        compiler_params=pltpu.CompilerParams(
            dimension_semantics=("parallel",),     # batch blocks independent (v7x 2 TCs)
            vmem_limit_bytes=vmem_bytes,
        ),
        cost_estimate=pl.CostEstimate(flops=flops, transcendentals=0,
                                      bytes_accessed=bytes_acc),
    )(*conv_args, wmap_rep, lb)
    return out[:B]


def ndvi_reference(x_nchw, conv_w, conv_b, lin_w, lin_b):
    """Pure-JAX reference matching the PyTorch forward pass."""
    conv = lax.conv_general_dilated(
        x_nchw.astype(jnp.float32), conv_w.astype(jnp.float32),
        window_strides=(1, 1), padding="VALID",
        dimension_numbers=("NCHW", "OIHW", "NCHW"),
        precision=lax.Precision.HIGHEST) + conv_b.reshape(1, 1, 1, 1)
    pool = lax.reduce_window(
        conv, -jnp.inf, lax.max,
        window_dimensions=(1, 1, POOL, POOL),
        window_strides=(1, 1, POOL, POOL), padding="VALID")
    flat = pool.reshape(x_nchw.shape[0], -1)                 # (B, 961)
    return jnp.sum(flat * lin_w[0][None, :], axis=1, keepdims=True) + lin_b


if __name__ == "__main__":
    key = jax.random.PRNGKey(0)
    k_x, k_cw, k_cb, k_lw, k_lb = jax.random.split(key, 5)

    B = 2
    x = jax.random.normal(k_x, (B, 1, H_IN, W_IN), jnp.float32)      # synthetic NDVI batch

    # Deterministic synthetic parameters (PyTorch-default-style uniform bounds).
    cw_bound = 1.0 / (1 * CONV_K * CONV_K) ** 0.5
    conv_w = jax.random.uniform(k_cw, (1, 1, CONV_K, CONV_K), jnp.float32,
                                -cw_bound, cw_bound)
    conv_b = jax.random.uniform(k_cb, (1,), jnp.float32, -cw_bound, cw_bound)
    lw_bound = 1.0 / (P_OUT * P_OUT) ** 0.5
    lin_w = jax.random.uniform(k_lw, (1, P_OUT * P_OUT), jnp.float32,
                               -lw_bound, lw_bound)
    lin_b = jax.random.uniform(k_lb, (1,), jnp.float32, -lw_bound, lw_bound)

    out = jax.block_until_ready(ndvi_forward(x, conv_w, conv_b, lin_w, lin_b))
    ref = jax.block_until_ready(ndvi_reference(x, conv_w, conv_b, lin_w, lin_b))

    assert out.shape == (B, 1), out.shape
    # f32-exact on the VPU path; the MXU path feeds bf16 operands (f32 accumulation),
    # so allow a bf16-level tolerance while the 961-term reduction stays f32.
    assert jnp.allclose(out, ref, atol=5e-3, rtol=5e-3), (out, ref)
    print("KERNEL_OK")
</pallas_src>

<mosaic_0001>
module attributes {stable_mosaic.version = 11 : i64} {
  func.func @probe(%arg0: memref<8x128xf32, #tpu.memory_space<vmem>>, %arg1: memref<8x128xf32, #tpu.memory_space<vmem>>, %arg2: memref<8x128xf32, #tpu.memory_space<vmem>>) attributes {dimension_semantics = [], scalar_prefetch = 0 : i64, scratch_operands = 0 : i64, tpu.core_type = #tpu.core_type<tc>} {
    %c0 = arith.constant 0 : index
    %c0_0 = arith.constant 0 : index
    %0 = vector.load %arg0[%c0, %c0_0] : memref<8x128xf32, #tpu.memory_space<vmem>>, vector<8x128xf32>
    %c1_i32 = arith.constant 1 : i32
    %1 = tpu.dynamic_rotate %0 by %c1_i32 dim 1 : vector<8x128xf32>, i32 -> vector<8x128xf32>
    %c0_1 = arith.constant 0 : index
    %c0_2 = arith.constant 0 : index
    %2 = vector.load %arg1[%c0_1, %c0_2] : memref<8x128xf32, #tpu.memory_space<vmem>>, vector<8x128xf32>
    tpu.vector_store %arg1[%c0_1, %c0_2], %1 {strides = array<i32>} : memref<8x128xf32, #tpu.memory_space<vmem>>, vector<8x128xf32>,
    %c0_3 = arith.constant 0 : index
    %c0_4 = arith.constant 0 : index
    %3 = vector.load %arg0[%c0_3, %c0_4] : memref<8x128xf32, #tpu.memory_space<vmem>>, vector<8x128xf32>
    %c1_i32_5 = arith.constant 1 : i32
    %4 = tpu.dynamic_rotate %3 by %c1_i32_5 dim 0 : vector<8x128xf32>, i32 -> vector<8x128xf32>
    %c0_6 = arith.constant 0 : index
    %c0_7 = arith.constant 0 : index
    %5 = vector.load %arg2[%c0_6, %c0_7] : memref<8x128xf32, #tpu.memory_space<vmem>>, vector<8x128xf32>
    tpu.vector_store %arg2[%c0_6, %c0_7], %4 {strides = array<i32>} : memref<8x128xf32, #tpu.memory_space<vmem>>, vector<8x128xf32>,
    return
  }
}

</mosaic_0001>

<bundles_post_ra>
// kernel: tpu_custom_call.1
= control target key start
LH: loop header
LB: loop body
LE: loop exit
PB: predicated region body
PF: predicated region fallthrough
CT: control target
= control target key end

     0   :  { %8 = vsyncpa [#allocation3], 0  ;;  %s191_s0 = inlined_call_operand.hbm [shape: f32[8,128], index: 0, kind: input, shape index: {}]   ;;  %s192_s1 = inlined_call_operand.hbm [shape: f32[8,128], index: 1, kind: output, shape index: {0}]   ;;  %s193_s2 = inlined_call_operand.hbm [shape: f32[8,128], index: 2, kind: output, shape index: {1}]  }
   0x1   :  { %9 = vsyncpa [#allocation4], 0 }
   0x2   :  { %10 = vsyncpa [#allocation7], 0  ;;  %s136_s9 = smov [#allocation2]   ;;  %s64_s13 = scalar_lea.hbm %s191_s0, 128 }
   0x3   :  { %s17_s10 = sshll.u32 %s136_s9, 4  ;;  %p65_p0 = scmp.ne.s32.totalorder %s191_s0, %s64_s13  ;;  %s18_s10 = int_to_ptr.vmem [resolvable:$true] %s17_s10 }
   0x4   :  { %p68_p1 = scmp.lt.u32.totalorder %s64_s13, %s191_s0 }
   0x6   :  { %p70_p2 = pnand %p68_p1, %p65_p0 }
   0x8   :  { %73 = shalt.err (!%p70_p2)
}
   0x9   :  { %s74_s18 = scalar_lea.vmem %s18_s10, 128  ;;  %p79_p4 = scmp.lt.s32.totalorder %s18_s10, %s18_s10 }
   0xa   :  { %p75_p3 = scmp.ne.s32.totalorder %s18_s10, %s74_s18  ;;  %p80_p5 = scmp.lt.s32.totalorder %s74_s18, %s74_s18 }
   0xc   :  { %p81_p6 = por %p80_p5, %p79_p4 }
   0xe   :  { %p82_p7 = pnand %p81_p6, %p75_p3 }
  0x10   :  { %85 = shalt.err (!%p82_p7)
}
  0x11   :  { %20 = dma.hbm_to_vmem [thread:$0]  %s191_s0, 128, %s18_s10, [#allocation3]  }
  0x12   :  { %130 = dma.done.wait [#allocation3], 128  }
  0x13   :  { %131 = vsyncadd [#allocation3], 4294967168  ;;  %s137_s21 = smov [#allocation6]   ;;  %v24_v0 = vld [vmem:[#allocation2] sm:$0xff]  ;;  %s138_s23 = smov 1  }
  0x14   :  { %s47_s22 = sshll.u32 %s137_s21, 4  ;;  %25 = vrot.lane.b32.xlu0 %v24_v0, %s138_s23  ;;  %v29_v1 = vrot.slane %v24_v0, 7  ;;  %s48_s22 = int_to_ptr.vmem [resolvable:$true] %s47_s22 }
  0x15   :  { %s86_s24 = scalar_lea.vmem %s48_s22, 128  ;;  %p91_p9 = scmp.lt.s32.totalorder %s48_s22, %s48_s22 }
  0x16   :  { %30 = vst [vmem:[#allocation6] sm:$0xff] %v29_v1  ;;  %p87_p8 = scmp.ne.s32.totalorder %s48_s22, %s86_s24  ;;  %p92_p10 = scmp.lt.s32.totalorder %s86_s24, %s86_s24 }
  0x18   :  { %p93_p11 = por %p92_p10, %p91_p9 }
  0x1a   :  { %p94_p12 = pnand %p93_p11, %p87_p8 }
  0x1c   :  { %97 = shalt.err (!%p94_p12)
}
  0x1d   :  { %s98_s0 = scalar_lea.hbm %s193_s2, 128 }
  0x1e   :  { %p99_p13 = scmp.ne.s32.totalorder %s193_s2, %s98_s0  ;;  %p102_p0 = scmp.lt.u32.totalorder %s98_s0, %s193_s2 }
  0x20   :  { %p104_p1 = pnand %p102_p0, %p99_p13 }
  0x22   :  { %107 = shalt.err (!%p104_p1)
}
  0x23   :  { %50 = dma.vmem_to_hbm [thread:$0]  %s48_s22, 128, %s193_s2, [#allocation7]  }
  0x24   :  { %s139_s5 = smov [#allocation5]  }
  0x25   :  { %s37_s6 = sshll.u32 %s139_s5, 4  ;;  %s38_s6 = int_to_ptr.vmem [resolvable:$true] %s37_s6 }
  0x26   :  { %s108_s7 = scalar_lea.vmem %s38_s6, 128  ;;  %p113_p3 = scmp.lt.s32.totalorder %s38_s6, %s38_s6 }
  0x27   :  { %p109_p2 = scmp.ne.s32.totalorder %s38_s6, %s108_s7  ;;  %p114_p4 = scmp.lt.s32.totalorder %s108_s7, %s108_s7 }
  0x29   :  { %p115_p5 = por %p114_p4, %p113_p3 }
  0x2b   :  { %p116_p6 = pnand %p115_p5, %p109_p2 }
  0x86   :  { %v26_v2 = vpop.permute.xlu0 %25 }
  0x87   :  { %27 = vst [vmem:[#allocation5] sm:$0xff] %v26_v2 }
  0x88   :  { %119 = shalt.err (!%p116_p6)
}
  0x89   :  { %s120_s10 = scalar_lea.hbm %s192_s1, 128 }
  0x8a   :  { %p121_p7 = scmp.ne.s32.totalorder %s192_s1, %s120_s10  ;;  %p124_p8 = scmp.lt.u32.totalorder %s120_s10, %s192_s1 }
  0x8c   :  { %p126_p9 = pnand %p124_p8, %p121_p7 }
  0x8e   :  { %129 = shalt.err (!%p126_p9)
}
  0x8f   :  { %40 = dma.vmem_to_hbm [thread:$0]  %s38_s6, 128, %s192_s1, [#allocation4]  }
  0x90   :  { %132 = dma.done.wait [#allocation4], 128  }
  0x91   :  { %133 = vsyncadd [#allocation4], 4294967168 }
  0x92   :  { %134 = dma.done.wait [#allocation7], 128  }
  0x93   :  { %135 = vsyncadd [#allocation7], 4294967168 }
  0x94   :  { %57 = vsyncpa [#allocation3], 1 }
  0x95   :  { %58 = vsyncpa [#allocation4], 1 }
  0x96   :  { %59 = vsyncpa [#allocation7], 1 }

</bundles_post_ra>
